<compile_context>
chip_gen: v6e
topology: v6e:2x2x1
jax: 0.10.0
libtpu: 0.0.40
codegen_flags: <defaults>
</compile_context>

<pallas_src>
import jax
import jax.numpy as jnp
from jax.experimental import pallas as pl
from jax.experimental.pallas import tpu as pltpu


def _sweep_kernel(x_ref, w_ref, b_ref, o_ref, state_ref):
    """One step of a directional sweep.

    x_ref:     (1, tm, c)  current input column slice (direction-ordered)
    w_ref:     (c, c)      effective conv weight stored (c_in, c_out)
    b_ref:     (1, c)      bias
    o_ref:     (1, tm, c)  output column slice
    state_ref: (tm, c) f32 previous output column (the recurrence carry)
    """
    step = pl.program_id(1)

    @pl.when(step == 0)
    def _first():
        col = x_ref[0].astype(jnp.float32)
        state_ref[...] = col
        o_ref[0] = col.astype(o_ref.dtype)

    @pl.when(step > 0)
    def _rest():
        prev = state_ref[...].astype(w_ref.dtype)          # native dtype into MXU
        y = jnp.dot(prev, w_ref[...], preferred_element_type=jnp.float32)
        y = jnp.maximum(y + b_ref[...].astype(jnp.float32), 0.0)
        col = y + x_ref[0].astype(jnp.float32)             # residual add (f32)
        state_ref[...] = col
        o_ref[0] = col.astype(o_ref.dtype)


def _pick_tm(m):
    for tm in (512, 256, 128, 64, 32, 16, 8):
        if m % tm == 0:
            return tm
    return m  # block == full dim, so no (8,128) divisibility constraint


def _sweep(x_wmc, w_kn, b2d, *, reverse, tm):
    w, m, c = x_wmc.shape
    if reverse:
        col_ix = lambda mi, i: (w - 1 - i, mi, 0)
    else:
        col_ix = lambda mi, i: (i, mi, 0)

    return pl.pallas_call(
        _sweep_kernel,
        out_shape=jax.ShapeDtypeStruct((w, m, c), x_wmc.dtype),
        grid_spec=pltpu.PrefetchScalarGridSpec(
            num_scalar_prefetch=0,
            grid=(m // tm, w),
            in_specs=[
                pl.BlockSpec((1, tm, c), col_ix),
                pl.BlockSpec((c, c), lambda mi, i: (0, 0)),
                pl.BlockSpec((1, c), lambda mi, i: (0, 0)),
            ],
            out_specs=pl.BlockSpec((1, tm, c), col_ix),
            scratch_shapes=[pltpu.VMEM((tm, c), jnp.float32)],
        ),
        compiler_params=pltpu.CompilerParams(
            dimension_semantics=("parallel", "arbitrary"),
        ),
    )(x_wmc, w_kn, b2d)


@jax.jit
def conv_lr_forward(fea, conv_weight, conv_bias):
    """Pallas implementation of convLR.forward.

    fea:         (n, c, h, w)
    conv_weight: (c, c, kh, kw)  -- PyTorch Conv2d layout (out, in, kh, kw)
    conv_bias:   (c,)
    """
    n, c, h, w = fea.shape
    c_out, c_in, kh, kw = conv_weight.shape
    assert c_out == c and c_in == c
    # TODO(synk): kh > 1 (height mixing inside each width-1 column) not implemented;
    # the module default kernel_size=(1, kw) only ever uses the center width tap.
    assert kh == 1, "only kernel_size=(1, kw) is supported"

    w_eff = conv_weight[:, :, 0, (kw - 1) // 2]   # (c_out, c_in): only tap that sees data
    w_kn = jnp.transpose(w_eff)                   # (c_in, c_out): MXU-native (K,N)
    b2d = conv_bias.reshape(1, c)

    m = n * h
    tm = _pick_tm(m)

    # (n, c, h, w) -> (w, n*h, c): columns on the grid axis, channels lane-dense.
    x_wmc = jnp.transpose(fea, (3, 0, 2, 1)).reshape(w, m, c)

    mid = _sweep(x_wmc, w_kn, b2d, reverse=False, tm=tm)   # left -> right
    out_wmc = _sweep(mid, w_kn, b2d, reverse=True, tm=tm)  # right -> left

    out = out_wmc.reshape(w, n, h, c)
    return jnp.transpose(out, (1, 3, 2, 0))                # (n, c, h, w)


def conv_lr_reference(fea, conv_weight, conv_bias):
    """Pure-JAX reference with the exact PyTorch recurrence."""
    n, c, h, w = fea.shape
    kw = conv_weight.shape[3]
    w_eff = conv_weight[:, :, 0, (kw - 1) // 2]   # (c_out, c_in)

    def conv_relu(col):  # col: (n, c, h)
        y = jnp.einsum("oc,nch->noh", w_eff, col,
                       precision=jax.lax.Precision.HIGHEST)
        return jnp.maximum(y + conv_bias[None, :, None], 0.0)

    cols = [fea[:, :, :, i] for i in range(w)]
    stack = [cols[0]]
    for i in range(1, w):
        stack.append(conv_relu(stack[i - 1]) + cols[i])
    for i in range(w):
        pos = w - 1 - i
        if pos == w - 1:
            continue
        stack[pos] = conv_relu(stack[pos + 1]) + stack[pos]
    return jnp.stack(stack, axis=3)


def init_convlr_params(key, channels, kernel_size=(1, 9), dtype=jnp.float32):
    """Deterministic init mimicking nn.Conv2d default (uniform +/- 1/sqrt(fan_in))."""
    kh, kw = kernel_size
    fan_in = channels * kh * kw
    bound = 1.0 / (fan_in ** 0.5)
    k_w, k_b = jax.random.split(key)
    weight = jax.random.uniform(k_w, (channels, channels, kh, kw), dtype,
                                minval=-bound, maxval=bound)
    bias = jax.random.uniform(k_b, (channels,), dtype,
                              minval=-bound, maxval=bound)
    return weight, bias


if __name__ == "__main__":
    key = jax.random.PRNGKey(0)
    k_x, k_p = jax.random.split(key)

    # Small but lane-dense example (real module uses c=2048).
    n, c, h, w = 2, 128, 8, 8
    fea = jax.random.normal(k_x, (n, c, h, w), jnp.float32)
    conv_weight, conv_bias = init_convlr_params(k_p, c, kernel_size=(1, 9))

    out = conv_lr_forward(fea, conv_weight, conv_bias)
    out = jax.block_until_ready(out)

    ref = conv_lr_reference(fea, conv_weight, conv_bias)
    assert out.shape == (n, c, h, w)
    # MXU f32 matmul precision differs slightly from the HIGHEST-precision
    # reference einsum; tolerance sized for that, still catches layout/semantic bugs.
    assert jnp.allclose(out, ref, atol=5e-3, rtol=5e-3), (
        "mismatch vs reference: max abs err "
        f"{jnp.max(jnp.abs(out - ref)):.3e}")

    print("KERNEL_OK")
</pallas_src>

<mosaic_0001>
module attributes {stable_mosaic.version = 11 : i64} {
  func.func @_sweep_kernel(%arg0: i32, %arg1: i32, %arg2: memref<1x16x128xf32, #tpu.memory_space<vmem>>, %arg3: memref<128x128xf32, #tpu.memory_space<vmem>>, %arg4: memref<1x128xf32, #tpu.memory_space<vmem>>, %arg5: memref<1x16x128xf32, #tpu.memory_space<vmem>>, %arg6: memref<16x128xf32, #tpu.memory_space<vmem>>) attributes {dimension_semantics = [#tpu.dimension_semantics<parallel>, #tpu.dimension_semantics<arbitrary>], iteration_bounds = array<i64: 1, 8>, scalar_prefetch = 0 : i64, scratch_operands = 1 : i64, tpu.core_type = #tpu.core_type<tc>, window_params = [{transform_indices = @transform_0, window_bounds = array<i64: 1, 16, 128>}, {pipeline_mode = #tpu.pipeline_mode<synchronous>, transform_indices = @transform_1, window_bounds = array<i64: 128, 128>}, {pipeline_mode = #tpu.pipeline_mode<synchronous>, transform_indices = @transform_2, window_bounds = array<i64: 1, 128>}, {transform_indices = @transform_3, window_bounds = array<i64: 1, 16, 128>}]} {
    %c0_i32 = arith.constant 0 : i32
    %0 = arith.cmpi eq, %arg1, %c0_i32 : i32
    %1 = arith.extui %0 : i1 to i32
    %c0_i32_0 = arith.constant 0 : i32
    %2 = arith.cmpi ne, %1, %c0_i32_0 : i32
    scf.if %2 {
      %c0 = arith.constant 0 : index
      %c0_3 = arith.constant 0 : index
      %c0_4 = arith.constant 0 : index
      %6 = vector.load %arg2[%c0, %c0_3, %c0_4] : memref<1x16x128xf32, #tpu.memory_space<vmem>>, vector<1x16x128xf32>
      %7 = vector.shape_cast %6 : vector<1x16x128xf32> to vector<16x128xf32>
      %c0_5 = arith.constant 0 : index
      %c0_6 = arith.constant 0 : index
      %8 = vector.load %arg6[%c0_5, %c0_6] : memref<16x128xf32, #tpu.memory_space<vmem>>, vector<16x128xf32>
      tpu.vector_store %arg6[%c0_5, %c0_6], %7 {strides = array<i32>} : memref<16x128xf32, #tpu.memory_space<vmem>>, vector<16x128xf32>,
      %c0_7 = arith.constant 0 : index
      %c0_8 = arith.constant 0 : index
      %c0_9 = arith.constant 0 : index
      %9 = vector.load %arg5[%c0_7, %c0_8, %c0_9] : memref<1x16x128xf32, #tpu.memory_space<vmem>>, vector<1x16x128xf32>
      %10 = vector.shape_cast %9 : vector<1x16x128xf32> to vector<16x128xf32>
      %11 = vector.shape_cast %7 : vector<16x128xf32> to vector<1x16x128xf32>
      tpu.vector_store %arg5[%c0_7, %c0_8, %c0_9], %11 {strides = array<i32>} : memref<1x16x128xf32, #tpu.memory_space<vmem>>, vector<1x16x128xf32>,
    } else {
    }
    %c0_i32_1 = arith.constant 0 : i32
    %3 = arith.cmpi sgt, %arg1, %c0_i32_1 : i32
    %4 = arith.extui %3 : i1 to i32
    %c0_i32_2 = arith.constant 0 : i32
    %5 = arith.cmpi ne, %4, %c0_i32_2 : i32
    scf.if %5 {
      %c0 = arith.constant 0 : index
      %c0_3 = arith.constant 0 : index
      %6 = vector.load %arg6[%c0, %c0_3] : memref<16x128xf32, #tpu.memory_space<vmem>>, vector<16x128xf32>
      %c0_4 = arith.constant 0 : index
      %c0_5 = arith.constant 0 : index
      %7 = vector.load %arg3[%c0_4, %c0_5] : memref<128x128xf32, #tpu.memory_space<vmem>>, vector<128x128xf32>
      %cst = arith.constant dense<0.000000e+00> : vector<16x128xf32>
      %8 = tpu.matmul %6, %7, %cst {dimension_numbers = #tpu.dot_dimension_numbers<[1], [0], [0], [1], [0, 0, 1, 1], [], []>} : vector<16x128xf32>, vector<128x128xf32>, vector<16x128xf32> -> vector<16x128xf32>
      %c0_6 = arith.constant 0 : index
      %c0_7 = arith.constant 0 : index
      %9 = vector.load %arg4[%c0_6, %c0_7] : memref<1x128xf32, #tpu.memory_space<vmem>>, vector<1x128xf32>
      %10 = vector.broadcast %9 : vector<1x128xf32> to vector<16x128xf32>
      %11 = arith.addf %8, %10 : vector<16x128xf32>
      %cst_8 = arith.constant 0.000000e+00 : f32
      %12 = vector.broadcast %cst_8 : f32 to vector<16x128xf32>
      %13 = arith.maximumf %11, %12 : vector<16x128xf32>
      %c0_9 = arith.constant 0 : index
      %c0_10 = arith.constant 0 : index
      %c0_11 = arith.constant 0 : index
      %14 = vector.load %arg2[%c0_9, %c0_10, %c0_11] : memref<1x16x128xf32, #tpu.memory_space<vmem>>, vector<1x16x128xf32>
      %15 = vector.shape_cast %14 : vector<1x16x128xf32> to vector<16x128xf32>
      %16 = arith.addf %13, %15 : vector<16x128xf32>
      %c0_12 = arith.constant 0 : index
      %c0_13 = arith.constant 0 : index
      %17 = vector.load %arg6[%c0_12, %c0_13] : memref<16x128xf32, #tpu.memory_space<vmem>>, vector<16x128xf32>
      tpu.vector_store %arg6[%c0_12, %c0_13], %16 {strides = array<i32>} : memref<16x128xf32, #tpu.memory_space<vmem>>, vector<16x128xf32>,
      %c0_14 = arith.constant 0 : index
      %c0_15 = arith.constant 0 : index
      %c0_16 = arith.constant 0 : index
      %18 = vector.load %arg5[%c0_14, %c0_15, %c0_16] : memref<1x16x128xf32, #tpu.memory_space<vmem>>, vector<1x16x128xf32>
      %19 = vector.shape_cast %18 : vector<1x16x128xf32> to vector<16x128xf32>
      %20 = vector.shape_cast %16 : vector<16x128xf32> to vector<1x16x128xf32>
      tpu.vector_store %arg5[%c0_14, %c0_15, %c0_16], %20 {strides = array<i32>} : memref<1x16x128xf32, #tpu.memory_space<vmem>>, vector<1x16x128xf32>,
    } else {
    }
    return
  }
  func.func @transform_0(%arg0: i32, %arg1: i32) -> (i32, i32, i32) {
    %c7_i32 = arith.constant 7 : i32
    %0 = arith.subi %c7_i32, %arg1 : i32
    %c0_i32 = arith.constant 0 : i32
    %c0_i32_0 = arith.constant 0 : i32
    return %0, %arg0, %c0_i32 : i32, i32, i32
  }
  func.func @transform_1(%arg0: i32, %arg1: i32) -> (i32, i32) {
    %c0_i32 = arith.constant 0 : i32
    %c0_i32_0 = arith.constant 0 : i32
    %c0_i32_1 = arith.constant 0 : i32
    return %c0_i32, %c0_i32_0 : i32, i32
  }
  func.func @transform_2(%arg0: i32, %arg1: i32) -> (i32, i32) {
    %c0_i32 = arith.constant 0 : i32
    %c0_i32_0 = arith.constant 0 : i32
    %c0_i32_1 = arith.constant 0 : i32
    return %c0_i32, %c0_i32_0 : i32, i32
  }
  func.func @transform_3(%arg0: i32, %arg1: i32) -> (i32, i32, i32) {
    %c7_i32 = arith.constant 7 : i32
    %0 = arith.subi %c7_i32, %arg1 : i32
    %c0_i32 = arith.constant 0 : i32
    %c0_i32_0 = arith.constant 0 : i32
    return %0, %arg0, %c0_i32 : i32, i32, i32
  }
}

module attributes {stable_mosaic.version = 11 : i64} {
  func.func @_sweep_kernel(%arg0: i32, %arg1: i32, %arg2: memref<1x16x128xf32, #tpu.memory_space<vmem>>, %arg3: memref<128x128xf32, #tpu.memory_space<vmem>>, %arg4: memref<1x128xf32, #tpu.memory_space<vmem>>, %arg5: memref<1x16x128xf32, #tpu.memory_space<vmem>>, %arg6: memref<16x128xf32, #tpu.memory_space<vmem>>) attributes {dimension_semantics = [#tpu.dimension_semantics<parallel>, #tpu.dimension_semantics<arbitrary>], iteration_bounds = array<i64: 1, 8>, scalar_prefetch = 0 : i64, scratch_operands = 1 : i64, tpu.core_type = #tpu.core_type<tc>, window_params = [{transform_indices = @transform_0, window_bounds = array<i64: 1, 16, 128>}, {pipeline_mode = #tpu.pipeline_mode<synchronous>, transform_indices = @transform_1, window_bounds = array<i64: 128, 128>}, {pipeline_mode = #tpu.pipeline_mode<synchronous>, transform_indices = @transform_2, window_bounds = array<i64: 1, 128>}, {transform_indices = @transform_3, window_bounds = array<i64: 1, 16, 128>}]} {
    %c0_i32 = arith.constant 0 : i32
    %0 = arith.cmpi eq, %arg1, %c0_i32 : i32
    %1 = arith.extui %0 : i1 to i32
    %c0_i32_0 = arith.constant 0 : i32
    %2 = arith.cmpi ne, %1, %c0_i32_0 : i32
    scf.if %2 {
      %c0 = arith.constant 0 : index
      %c0_3 = arith.constant 0 : index
      %c0_4 = arith.constant 0 : index
      %6 = vector.load %arg2[%c0, %c0_3, %c0_4] : memref<1x16x128xf32, #tpu.memory_space<vmem>>, vector<1x16x128xf32>
      %7 = vector.shape_cast %6 : vector<1x16x128xf32> to vector<16x128xf32>
      %c0_5 = arith.constant 0 : index
      %c0_6 = arith.constant 0 : index
      %8 = vector.load %arg6[%c0_5, %c0_6] : memref<16x128xf32, #tpu.memory_space<vmem>>, vector<16x128xf32>
      tpu.vector_store %arg6[%c0_5, %c0_6], %7 {strides = array<i32>} : memref<16x128xf32, #tpu.memory_space<vmem>>, vector<16x128xf32>,
      %c0_7 = arith.constant 0 : index
      %c0_8 = arith.constant 0 : index
      %c0_9 = arith.constant 0 : index
      %9 = vector.load %arg5[%c0_7, %c0_8, %c0_9] : memref<1x16x128xf32, #tpu.memory_space<vmem>>, vector<1x16x128xf32>
      %10 = vector.shape_cast %9 : vector<1x16x128xf32> to vector<16x128xf32>
      %11 = vector.shape_cast %7 : vector<16x128xf32> to vector<1x16x128xf32>
      tpu.vector_store %arg5[%c0_7, %c0_8, %c0_9], %11 {strides = array<i32>} : memref<1x16x128xf32, #tpu.memory_space<vmem>>, vector<1x16x128xf32>,
    } else {
    }
    %c0_i32_1 = arith.constant 0 : i32
    %3 = arith.cmpi sgt, %arg1, %c0_i32_1 : i32
    %4 = arith.extui %3 : i1 to i32
    %c0_i32_2 = arith.constant 0 : i32
    %5 = arith.cmpi ne, %4, %c0_i32_2 : i32
    scf.if %5 {
      %c0 = arith.constant 0 : index
      %c0_3 = arith.constant 0 : index
      %6 = vector.load %arg6[%c0, %c0_3] : memref<16x128xf32, #tpu.memory_space<vmem>>, vector<16x128xf32>
      %c0_4 = arith.constant 0 : index
      %c0_5 = arith.constant 0 : index
      %7 = vector.load %arg3[%c0_4, %c0_5] : memref<128x128xf32, #tpu.memory_space<vmem>>, vector<128x128xf32>
      %cst = arith.constant dense<0.000000e+00> : vector<16x128xf32>
      %8 = tpu.matmul %6, %7, %cst {dimension_numbers = #tpu.dot_dimension_numbers<[1], [0], [0], [1], [0, 0, 1, 1], [], []>} : vector<16x128xf32>, vector<128x128xf32>, vector<16x128xf32> -> vector<16x128xf32>
      %c0_6 = arith.constant 0 : index
      %c0_7 = arith.constant 0 : index
      %9 = vector.load %arg4[%c0_6, %c0_7] : memref<1x128xf32, #tpu.memory_space<vmem>>, vector<1x128xf32>
      %10 = vector.broadcast %9 : vector<1x128xf32> to vector<16x128xf32>
      %11 = arith.addf %8, %10 : vector<16x128xf32>
      %cst_8 = arith.constant 0.000000e+00 : f32
      %12 = vector.broadcast %cst_8 : f32 to vector<16x128xf32>
      %13 = arith.maximumf %11, %12 : vector<16x128xf32>
      %c0_9 = arith.constant 0 : index
      %c0_10 = arith.constant 0 : index
      %c0_11 = arith.constant 0 : index
      %14 = vector.load %arg2[%c0_9, %c0_10, %c0_11] : memref<1x16x128xf32, #tpu.memory_space<vmem>>, vector<1x16x128xf32>
      %15 = vector.shape_cast %14 : vector<1x16x128xf32> to vector<16x128xf32>
      %16 = arith.addf %13, %15 : vector<16x128xf32>
      %c0_12 = arith.constant 0 : index
      %c0_13 = arith.constant 0 : index
      %17 = vector.load %arg6[%c0_12, %c0_13] : memref<16x128xf32, #tpu.memory_space<vmem>>, vector<16x128xf32>
      tpu.vector_store %arg6[%c0_12, %c0_13], %16 {strides = array<i32>} : memref<16x128xf32, #tpu.memory_space<vmem>>, vector<16x128xf32>,
      %c0_14 = arith.constant 0 : index
      %c0_15 = arith.constant 0 : index
      %c0_16 = arith.constant 0 : index
      %18 = vector.load %arg5[%c0_14, %c0_15, %c0_16] : memref<1x16x128xf32, #tpu.memory_space<vmem>>, vector<1x16x128xf32>
      %19 = vector.shape_cast %18 : vector<1x16x128xf32> to vector<16x128xf32>
      %20 = vector.shape_cast %16 : vector<16x128xf32> to vector<1x16x128xf32>
      tpu.vector_store %arg5[%c0_14, %c0_15, %c0_16], %20 {strides = array<i32>} : memref<1x16x128xf32, #tpu.memory_space<vmem>>, vector<1x16x128xf32>,
    } else {
    }
    return
  }
  func.func @transform_0(%arg0: i32, %arg1: i32) -> (i32, i32, i32) {
    %c0_i32 = arith.constant 0 : i32
    %c0_i32_0 = arith.constant 0 : i32
    return %arg1, %arg0, %c0_i32 : i32, i32, i32
  }
  func.func @transform_1(%arg0: i32, %arg1: i32) -> (i32, i32) {
    %c0_i32 = arith.constant 0 : i32
    %c0_i32_0 = arith.constant 0 : i32
    %c0_i32_1 = arith.constant 0 : i32
    return %c0_i32, %c0_i32_0 : i32, i32
  }
  func.func @transform_2(%arg0: i32, %arg1: i32) -> (i32, i32) {
    %c0_i32 = arith.constant 0 : i32
    %c0_i32_0 = arith.constant 0 : i32
    %c0_i32_1 = arith.constant 0 : i32
    return %c0_i32, %c0_i32_0 : i32, i32
  }
  func.func @transform_3(%arg0: i32, %arg1: i32) -> (i32, i32, i32) {
    %c0_i32 = arith.constant 0 : i32
    %c0_i32_0 = arith.constant 0 : i32
    return %arg1, %arg0, %c0_i32 : i32, i32, i32
  }
}

</mosaic_0001>

<bundles_post_ra>
// kernel: conv_lr_forward.3
= control target key start
LH: loop header
LB: loop body
LE: loop exit
PB: predicated region body
PF: predicated region fallthrough
CT: control target
= control target key end

     0   :  { %s573_s12 = smov 0   ;;  %s575_s13 = smov 0   ;;  %s669_s0 = inlined_call_operand.vmem [shape: f32[8,16,128], index: 0, kind: input, shape index: {}]   ;;  %s670_s1 = inlined_call_operand.vmem [shape: f32[128,128], index: 1, kind: input, shape index: {}]   ;;  %s671_s2 = inlined_call_operand.vmem [shape: f32[1,128], index: 2, kind: input, shape index: {}]   ;;  %s672_s3 = inlined_call_operand.vmem [shape: f32[8,16,128], index: 3, kind: output, shape index: {}]  }
   0x1   :  { %s577_s14 = smov 0  }
   0x2 LB: > { %s22_s15 = sadd.s32 1, %s547_s13  ;;  %p440_p0 = scmp.ge.s32.totalorder %s551_s14, 1  ;;  %s551_s14 = sphi %s577_s14, %s13_s14   ;;  %s547_s13 = sphi %s575_s13, %s674_s13   ;;  %s543_s12 = sphi %s573_s12, %s673_s12  }
   0x3   : > { %p23_p1 = scmp.ge.s32.totalorder %s22_s15, 8  ;;  %p164_p2 = scmp.lt.s32.totalorder %s551_s14, 9 }
   0x5   : > { %s676_s15 = smov (%p23_p1, %s22_s15), 0  ;;  %p165_p3 = pnand %p440_p0, %p164_p2 }
   0x6   : > { %s198_s16 = ssub.s32 (!%p165_p3), 7, %s543_s12  ;;  %p445_p5 = scmp.ne.s32.totalorder (!%p165_p3), %s543_s12, 0 }
   0x7   : > { %168 = sbr.rel (%p165_p3) target bundleno = 262 (0x106), region = 32  ;;  %p200_p4 = scmp.lt.s32.totalorder (!%p165_p3), %s198_s16, 7 }
   0xc   : > { %s678_s16 = smov (!%p200_p4, %s198_s16), 7  ;;  %225 = sbr.rel (%p445_p5) target bundleno = 20 (0x14), region = 36 }
   0xd   : > { %s450_s17 = sshll.u32 %s678_s16, 4 }
   0xe   : > { %s594_s20 = scalar_lea.vmem %s669_s0, %s450_s17  ;;  %s599_s23 = scalar_lea.vmem %s672_s3, %s450_s17 }
  0x11   : > { %v226_v0 = vld [vmem:[%s594_s20] sm:$0xff]  ;;  %v227_v1 = vld [vmem:[%s594_s20 + $0x8] sm:$0xff] }
  0x12   : > { %228 = vst [vmem:[#allocation2] sm:$0xff] %v226_v0  ;;  %230 = vst [vmem:[%s599_s23] sm:$0xff] %v226_v0 }
  0x13   : > { %229 = vst [vmem:[#allocation2 + $0x8] sm:$0xff] %v227_v1  ;;  %231 = vst [vmem:[%s599_s23 + $0x8] sm:$0xff] %v227_v1 }
  0x14 PF: > { %p446_p6 = scmp.le.s32.totalorder %s543_s12, 0 }
  0x16   : > { %235 = sbr.rel (%p446_p6) target bundleno = 262 (0x106), region = 40 }
  0x1b   : > { %v253_v2 = vld [vmem:[%s670_s1 + $0x78] sm:$0xff]  ;;  %v252_v3 = vld [vmem:[%s670_s1 + $0x70] sm:$0xff]  ;;  %v251_v4 = vld [vmem:[%s670_s1 + $0x68] sm:$0xff] }
  0x1c   : > { %470 = vmatprep.subr.mxu0 %v253_v2  ;;  %v250_v5 = vld [vmem:[%s670_s1 + $0x60] sm:$0xff]  ;;  %v249_v7 = vld [vmem:[%s670_s1 + $0x58] sm:$0xff]  ;;  %v248_v8 = vld [vmem:[%s670_s1 + $0x50] sm:$0xff] }
  0x1d   : > { %471 = vmatpush3.msra.mxu0 %v253_v2  ;;  %v236_v6 = vld [vmem:[#allocation2] sm:$0xff]  ;;  %v247_v9 = vld [vmem:[%s670_s1 + $0x48] sm:$0xff]  ;;  %v245_v11 = vld [vmem:[%s670_s1 + $0x38] sm:$0xff] }
  0x1e   : > { %472 = vmatprep.subr.mxu0 %v252_v3  ;;  %502 = vmatprep.mubr.f32.mxu0 %v236_v6  ;;  %v246_v10 = vld [vmem:[%s670_s1 + $0x40] sm:$0xff]  ;;  %v244_v12 = vld [vmem:[%s670_s1 + $0x30] sm:$0xff]  ;;  %v243_v13 = vld [vmem:[%s670_s1 + $0x28] sm:$0xff] }
  0x1f   : > { %473 = vmatpush3.msra.mxu0 %v252_v3  ;;  %v242_v14 = vld [vmem:[%s670_s1 + $0x20] sm:$0xff]  ;;  %v241_v15 = vld [vmem:[%s670_s1 + $0x18] sm:$0xff]  ;;  %v240_v16 = vld [vmem:[%s670_s1 + $0x10] sm:$0xff] }
  0x20   : > { %474 = vmatprep.subr.mxu0 %v251_v4  ;;  %v239_v17 = vld [vmem:[%s670_s1 + $0x8] sm:$0xff]  ;;  %v238_v18 = vld [vmem:[%s670_s1] sm:$0xff] }
  0x21   : > { %475 = vmatpush3.msra.mxu0 %v251_v4  ;;  %v237_v19 = vld [vmem:[#allocation2 + $0x8] sm:$0xff]  ;;  %v447_v20 = vld [vmem:[%s671_s2] ss:$0 sm:$0xff] }
  0x22   : > { %476 = vmatprep.subr.mxu0 %v250_v5  ;;  %v339_v23 = vld [vmem:[%s594_s20 + $0x8] sm:$0xff]  ;;  %v338_v27 = vld [vmem:[%s594_s20] sm:$0xff] }
  0x23   : > { %477 = vmatpush3.msra.mxu0 %v250_v5 }
  0x24   : > { %478 = vmatprep.subr.mxu0 %v249_v7 }
  0x25   : > { %479 = vmatpush3.msra.mxu0 %v249_v7 }
  0x26   : > { %480 = vmatprep.subr.mxu0 %v248_v8 }
  0x27   : > { %481 = vmatpush3.msra.mxu0 %v248_v8 }
  0x28   : > { %482 = vmatprep.subr.mxu0 %v247_v9 }
  0x29   : > { %483 = vmatpush3.msra.mxu0 %v247_v9 }
  0x2a   : > { %484 = vmatprep.subr.mxu0 %v246_v10 }
  0x2b   : > { %485 = vmatpush3.msra.mxu0 %v246_v10 }
  0x2c   : > { %486 = vmatprep.subr.mxu0 %v245_v11 }
  0x2d   : > { %487 = vmatpush3.msra.mxu0 %v245_v11 }
  0x2e   : > { %488 = vmatprep.subr.mxu0 %v244_v12 }
  0x2f   : > { %489 = vmatpush3.msra.mxu0 %v244_v12 }
  0x30   : > { %490 = vmatprep.subr.mxu0 %v243_v13 }
  0x31   : > { %491 = vmatpush3.msra.mxu0 %v243_v13 }
  0x32   : > { %492 = vmatprep.subr.mxu0 %v242_v14 }
  0x33   : > { %493 = vmatpush3.msra.mxu0 %v242_v14 }
  0x34   : > { %494 = vmatprep.subr.mxu0 %v241_v15 }
  0x35   : > { %495 = vmatpush3.msra.mxu0 %v241_v15 }
  0x36   : > { %496 = vmatprep.subr.mxu0 %v240_v16 }
  0x37   : > { %497 = vmatpush3.msra.mxu0 %v240_v16 }
  0x38   : > { %498 = vmatprep.subr.mxu0 %v239_v17 }
  0x39   : > { %499 = vmatpush3.msra.mxu0 %v239_v17 }
  0x3a   : > { %500 = vmatprep.subr.mxu0 %v238_v18 }
  0x3b   : > { %501 = vmatpush3.msra.mxu0 %v238_v18 }
  0x3c   : > { %503 = vmatmul.mubr.f32.vlgmr.msra.gmra.mxu0 %v237_v19 }
  0xfc   : > { %v504_v21 = vpop.f32.mrf.mxu0 }
  0xfd   : > { %v333_v22 = vadd.f32 %v504_v21, %v447_v20 }
  0xfe   : > { %v327_v24 = vpop.f32.mrf.mxu0 }
  0xff   : > { %v337_v25 = vmax.f32 %v333_v22, 0.0  ;;  %v328_v26 = vadd.f32 %v447_v20, %v327_v24 }
 0x101   : > { %v341_v28 = vadd.f32 %v339_v23, %v337_v25  ;;  %v336_v29 = vmax.f32 %v328_v26, 0.0 }
 0x103   : > { %343 = vst [vmem:[#allocation2 + $0x8] sm:$0xff] %v341_v28  ;;  %345 = vst [vmem:[%s599_s23 + $0x8] sm:$0xff] %v341_v28  ;;  %v340_v30 = vadd.f32 %v338_v27, %v336_v29 }
 0x105   : > { %342 = vst [vmem:[#allocation2] sm:$0xff] %v340_v30  ;;  %344 = vst [vmem:[%s599_s23] sm:$0xff] %v340_v30 }
 0x106 PF: > { %s13_s14 = sadd.s32 1, %s551_s14   ;;  %s673_s12 = smov %s547_s13 }
 0x107   : > { %p10_p7 = scmp.ge.s32.totalorder %s13_s14, 10   ;;  %s674_s13 = smov %s676_s15 }
 0x109   :  { %12 = sbr.rel (!%p10_p7) target bundleno = 2 (0x2), region = 70 }

// kernel: conv_lr_forward.2
= control target key start
LH: loop header
LB: loop body
LE: loop exit
PB: predicated region body
PF: predicated region fallthrough
CT: control target
= control target key end

     0   :  { %s558_s12 = smov 0   ;;  %s560_s13 = smov 0   ;;  %s654_s0 = inlined_call_operand.vmem [shape: f32[8,16,128], index: 0, kind: input, shape index: {}]   ;;  %s655_s1 = inlined_call_operand.vmem [shape: f32[128,128], index: 1, kind: input, shape index: {}]   ;;  %s656_s2 = inlined_call_operand.vmem [shape: f32[1,128], index: 2, kind: input, shape index: {}]   ;;  %s657_s3 = inlined_call_operand.vmem [shape: f32[8,16,128], index: 3, kind: output, shape index: {}]  }
   0x1   :  { %s562_s14 = smov 0  }
   0x2 LB: > { %s22_s15 = sadd.s32 1, %s532_s13  ;;  %p425_p0 = scmp.ge.s32.totalorder %s536_s14, 1  ;;  %s536_s14 = sphi %s562_s14, %s13_s14   ;;  %s532_s13 = sphi %s560_s13, %s659_s13   ;;  %s528_s12 = sphi %s558_s12, %s658_s12  }
   0x3   : > { %p23_p1 = scmp.ge.s32.totalorder %s22_s15, 8  ;;  %p158_p2 = scmp.lt.s32.totalorder %s536_s14, 9 }
   0x5   : > { %s661_s15 = smov (%p23_p1, %s22_s15), 0  ;;  %p159_p3 = pnand %p425_p0, %p158_p2 }
   0x6   : > { %p191_p4 = scmp.lt.s32.totalorder (!%p159_p3), %s528_s12, 7  ;;  %p430_p5 = scmp.ne.s32.totalorder (!%p159_p3), %s528_s12, 0 }
   0x7   : > { %162 = sbr.rel (%p159_p3) target bundleno = 263 (0x107), region = 32 }
   0xc   : > { %s192_s16 = scalar_select %p191_p4, %s528_s12, 7 }
   0xd   : > { %213 = sbr.rel (%p430_p5) target bundleno = 21 (0x15), region = 36 }
   0xe   : > { %s435_s17 = sshll.u32 %s192_s16, 4 }
   0xf   : > { %s579_s20 = scalar_lea.vmem %s654_s0, %s435_s17  ;;  %s584_s23 = scalar_lea.vmem %s657_s3, %s435_s17 }
  0x12   : > { %v214_v0 = vld [vmem:[%s579_s20] sm:$0xff]  ;;  %v215_v1 = vld [vmem:[%s579_s20 + $0x8] sm:$0xff] }
  0x13   : > { %216 = vst [vmem:[#allocation2] sm:$0xff] %v214_v0  ;;  %218 = vst [vmem:[%s584_s23] sm:$0xff] %v214_v0 }
  0x14   : > { %217 = vst [vmem:[#allocation2 + $0x8] sm:$0xff] %v215_v1  ;;  %219 = vst [vmem:[%s584_s23 + $0x8] sm:$0xff] %v215_v1 }
  0x15 PF: > { %p431_p6 = scmp.le.s32.totalorder %s528_s12, 0 }
  0x17   : > { %223 = sbr.rel (%p431_p6) target bundleno = 263 (0x107), region = 40 }
  0x1c   : > { %v241_v2 = vld [vmem:[%s655_s1 + $0x78] sm:$0xff]  ;;  %v240_v3 = vld [vmem:[%s655_s1 + $0x70] sm:$0xff]  ;;  %v239_v4 = vld [vmem:[%s655_s1 + $0x68] sm:$0xff] }
  0x1d   : > { %455 = vmatprep.subr.mxu0 %v241_v2  ;;  %v238_v5 = vld [vmem:[%s655_s1 + $0x60] sm:$0xff]  ;;  %v237_v7 = vld [vmem:[%s655_s1 + $0x58] sm:$0xff]  ;;  %v236_v8 = vld [vmem:[%s655_s1 + $0x50] sm:$0xff] }
  0x1e   : > { %456 = vmatpush3.msra.mxu0 %v241_v2  ;;  %v224_v6 = vld [vmem:[#allocation2] sm:$0xff]  ;;  %v235_v9 = vld [vmem:[%s655_s1 + $0x48] sm:$0xff]  ;;  %v233_v11 = vld [vmem:[%s655_s1 + $0x38] sm:$0xff] }
  0x1f   : > { %457 = vmatprep.subr.mxu0 %v240_v3  ;;  %487 = vmatprep.mubr.f32.mxu0 %v224_v6  ;;  %v234_v10 = vld [vmem:[%s655_s1 + $0x40] sm:$0xff]  ;;  %v232_v12 = vld [vmem:[%s655_s1 + $0x30] sm:$0xff]  ;;  %v231_v13 = vld [vmem:[%s655_s1 + $0x28] sm:$0xff] }
  0x20   : > { %458 = vmatpush3.msra.mxu0 %v240_v3  ;;  %v230_v14 = vld [vmem:[%s655_s1 + $0x20] sm:$0xff]  ;;  %v229_v15 = vld [vmem:[%s655_s1 + $0x18] sm:$0xff]  ;;  %v228_v16 = vld [vmem:[%s655_s1 + $0x10] sm:$0xff] }
  0x21   : > { %459 = vmatprep.subr.mxu0 %v239_v4  ;;  %v227_v17 = vld [vmem:[%s655_s1 + $0x8] sm:$0xff]  ;;  %v226_v18 = vld [vmem:[%s655_s1] sm:$0xff] }
  0x22   : > { %460 = vmatpush3.msra.mxu0 %v239_v4  ;;  %v225_v19 = vld [vmem:[#allocation2 + $0x8] sm:$0xff]  ;;  %v432_v20 = vld [vmem:[%s656_s2] ss:$0 sm:$0xff] }
  0x23   : > { %461 = vmatprep.subr.mxu0 %v238_v5  ;;  %v327_v23 = vld [vmem:[%s579_s20 + $0x8] sm:$0xff]  ;;  %v326_v27 = vld [vmem:[%s579_s20] sm:$0xff] }
  0x24   : > { %462 = vmatpush3.msra.mxu0 %v238_v5 }
  0x25   : > { %463 = vmatprep.subr.mxu0 %v237_v7 }
  0x26   : > { %464 = vmatpush3.msra.mxu0 %v237_v7 }
  0x27   : > { %465 = vmatprep.subr.mxu0 %v236_v8 }
  0x28   : > { %466 = vmatpush3.msra.mxu0 %v236_v8 }
  0x29   : > { %467 = vmatprep.subr.mxu0 %v235_v9 }
  0x2a   : > { %468 = vmatpush3.msra.mxu0 %v235_v9 }
  0x2b   : > { %469 = vmatprep.subr.mxu0 %v234_v10 }
  0x2c   : > { %470 = vmatpush3.msra.mxu0 %v234_v10 }
  0x2d   : > { %471 = vmatprep.subr.mxu0 %v233_v11 }
  0x2e   : > { %472 = vmatpush3.msra.mxu0 %v233_v11 }
  0x2f   : > { %473 = vmatprep.subr.mxu0 %v232_v12 }
  0x30   : > { %474 = vmatpush3.msra.mxu0 %v232_v12 }
  0x31   : > { %475 = vmatprep.subr.mxu0 %v231_v13 }
  0x32   : > { %476 = vmatpush3.msra.mxu0 %v231_v13 }
  0x33   : > { %477 = vmatprep.subr.mxu0 %v230_v14 }
  0x34   : > { %478 = vmatpush3.msra.mxu0 %v230_v14 }
  0x35   : > { %479 = vmatprep.subr.mxu0 %v229_v15 }
  0x36   : > { %480 = vmatpush3.msra.mxu0 %v229_v15 }
  0x37   : > { %481 = vmatprep.subr.mxu0 %v228_v16 }
  0x38   : > { %482 = vmatpush3.msra.mxu0 %v228_v16 }
  0x39   : > { %483 = vmatprep.subr.mxu0 %v227_v17 }
  0x3a   : > { %484 = vmatpush3.msra.mxu0 %v227_v17 }
  0x3b   : > { %485 = vmatprep.subr.mxu0 %v226_v18 }
  0x3c   : > { %486 = vmatpush3.msra.mxu0 %v226_v18 }
  0x3d   : > { %488 = vmatmul.mubr.f32.vlgmr.msra.gmra.mxu0 %v225_v19 }
  0xfd   : > { %v489_v21 = vpop.f32.mrf.mxu0 }
  0xfe   : > { %v321_v22 = vadd.f32 %v489_v21, %v432_v20 }
  0xff   : > { %v315_v24 = vpop.f32.mrf.mxu0 }
 0x100   : > { %v325_v25 = vmax.f32 %v321_v22, 0.0  ;;  %v316_v26 = vadd.f32 %v432_v20, %v315_v24 }
 0x102   : > { %v329_v28 = vadd.f32 %v327_v23, %v325_v25  ;;  %v324_v29 = vmax.f32 %v316_v26, 0.0 }
 0x104   : > { %331 = vst [vmem:[#allocation2 + $0x8] sm:$0xff] %v329_v28  ;;  %333 = vst [vmem:[%s584_s23 + $0x8] sm:$0xff] %v329_v28  ;;  %v328_v30 = vadd.f32 %v326_v27, %v324_v29 }
 0x106   : > { %330 = vst [vmem:[#allocation2] sm:$0xff] %v328_v30  ;;  %332 = vst [vmem:[%s584_s23] sm:$0xff] %v328_v30 }
 0x107 PF: > { %s13_s14 = sadd.s32 1, %s536_s14   ;;  %s658_s12 = smov %s532_s13 }
 0x108   : > { %p10_p7 = scmp.ge.s32.totalorder %s13_s14, 10   ;;  %s659_s13 = smov %s661_s15 }
 0x10a   :  { %12 = sbr.rel (!%p10_p7) target bundleno = 2 (0x2), region = 70 }

</bundles_post_ra>
